<compile_context>
chip_gen: v7x
topology: tpu7x:2x2x1
jax: 0.10.0
libtpu: 0.0.40
codegen_flags: <defaults>
</compile_context>

<pallas_src>
import functools

import jax
import jax.numpy as jnp
from jax import lax
from jax.experimental import pallas as pl
from jax.experimental.pallas import tpu as pltpu


def _basic_block_kernel(x_ref, w1_ref, s1_ref, b1_ref, w2_ref, s2_ref, b2_ref,
                        out_ref, lhs1_ref, lhs2_ref, *, Bb, H, WC, dilation):
    """Fused BasicBlock for one batch block of Bb images.

    x_ref       : (Bb*H, W*C)       lane-packed rows (also residual source)
    w1/w2_ref   : (3*W*C, W*C)      kh-concatenated lane-packed Toeplitz bands
    s*/b*_ref   : (1, W*C)          folded BN affine, tiled over W
    out_ref     : (Bb*H, W*C)
    lhs1/lhs2   : (Bb*H, 3*W*C)     VMEM scratch: K=3*WC LHS slabs (conv1/conv2)
    """
    d = dilation

    # H-padding zero strips: written once; scratch persists across grid steps
    # and the data copies below never overwrite these rows.
    @pl.when(pl.program_id(0) == 0)
    def _init_halos():
        z = jnp.zeros((d, WC), lhs1_ref.dtype)
        for b in range(Bb):
            r0 = b * H
            lhs1_ref[r0:r0 + d, 0:WC] = z
            lhs1_ref[r0 + H - d:r0 + H, 2 * WC:3 * WC] = z
            lhs2_ref[r0:r0 + d, 0:WC] = z
            lhs2_ref[r0 + H - d:r0 + H, 2 * WC:3 * WC] = z

    x = x_ref[...]                                          # (Bb*H, WC)

    # ---- conv1 LHS slab: lane block kh holds rows shifted by (kh-1)*d within
    # each image ('same' H padding), so one K=3*WC matmul covers all kh taps.
    for b in range(Bb):
        r0 = b * H
        lhs1_ref[r0 + d:r0 + H, 0:WC] = x[r0:r0 + H - d, :]
        lhs1_ref[r0:r0 + H, WC:2 * WC] = x[r0:r0 + H, :]        # 8-aligned copy
        lhs1_ref[r0:r0 + H - d, 2 * WC:3 * WC] = x[r0 + d:r0 + H, :]

    # ---- conv1 + BN + ReLU (single MXU contraction, f32 accumulate) --------
    acc1 = jnp.dot(lhs1_ref[...], w1_ref[...],
                   preferred_element_type=jnp.float32)      # (Bb*H, WC)
    mid = jnp.maximum(acc1 * s1_ref[...] + b1_ref[...], 0.0)
    mid = mid.astype(lhs2_ref.dtype)

    # ---- conv2 LHS slab from the ReLU'd intermediate (never touches HBM) ---
    for b in range(Bb):
        r0 = b * H
        lhs2_ref[r0 + d:r0 + H, 0:WC] = mid[r0:r0 + H - d, :]
        lhs2_ref[r0:r0 + H, WC:2 * WC] = mid[r0:r0 + H, :]
        lhs2_ref[r0:r0 + H - d, 2 * WC:3 * WC] = mid[r0 + d:r0 + H, :]

    # ---- conv2 + BN ---------------------------------------------------------
    acc2 = jnp.dot(lhs2_ref[...], w2_ref[...],
                   preferred_element_type=jnp.float32)
    out = acc2 * s2_ref[...] + b2_ref[...]

    # ---- residual add (PSMNet BasicBlock: no ReLU after the add) ------------
    out_ref[...] = (out + x.astype(jnp.float32)).astype(out_ref.dtype)


def _lane_band_weights(w_hwio, W, dilation):
    """(3, 3, Cin, Cout) HWIO -> (3, W*Cin, W*Cout) lane-packed Toeplitz bands.

    band[kh][wi*Cin + ci, w*Cout + co] = w[kh, kw, ci, co] with
    wi = w + (kw - 1) * dilation, and 0 where wi falls outside [0, W)
    (the W-direction 'same' padding is folded into the weights)."""
    _, _, Cin, Cout = w_hwio.shape
    wi = jnp.arange(W)[:, None]
    wo = jnp.arange(W)[None, :]
    bands = []
    for kh in range(3):
        band = jnp.zeros((W * Cin, W * Cout), w_hwio.dtype)
        for kw in range(3):
            shift = (wi == wo + (kw - 1) * dilation).astype(w_hwio.dtype)
            band = band + jnp.kron(shift, w_hwio[kh, kw])
        bands.append(band)
    return jnp.stack(bands)


def _pick_batch_block(B, H, max_rows=512):
    """Largest divisor Bb of B with Bb*H a sublane-friendly, VMEM-sized tile."""
    best = B   # full batch is always a legal block (block == full array extent)
    for cand in range(1, B + 1):
        if B % cand == 0 and (cand * H) % 8 == 0 and cand * H <= max_rows:
            best = cand
    return best


def basic_block_forward(x_nchw, params, *, pad=1, dilation=1,
                        compute_dtype=jnp.bfloat16):
    """BasicBlock.forward, stride=1 / downsample=None.  NCHW in / NCHW out."""
    eff_pad = dilation if dilation > 1 else pad             # matches convbn()
    assert eff_pad == dilation, (
        "stride=1 / no-downsample BasicBlock requires 'same' convs "
        "(pad=1, dilation=1  or  any pad with dilation>1)")
    B, C, H, W = x_nchw.shape
    Cout = params["w1"].shape[-1]
    assert Cout == C, "residual add requires inplanes == planes"
    assert dilation < H
    WC = W * C

    # NCHW -> lane-packed rows: (B*H, W*C).  Lane dim = W*C (128 in the test).
    x = jnp.transpose(x_nchw, (0, 2, 3, 1)).reshape(B * H, WC)
    x = x.astype(compute_dtype)

    # Lane-packed block-Toeplitz weights, kh-concatenated along K -> (3*WC, WC).
    w1 = _lane_band_weights(params["w1"], W, dilation).reshape(3 * WC, WC)
    w2 = _lane_band_weights(params["w2"], W, dilation).reshape(3 * WC, WC)
    w1 = w1.astype(compute_dtype)
    w2 = w2.astype(compute_dtype)
    s1 = jnp.tile(params["scale1"], W).reshape(1, WC).astype(jnp.float32)
    b1 = jnp.tile(params["bias1"], W).reshape(1, WC).astype(jnp.float32)
    s2 = jnp.tile(params["scale2"], W).reshape(1, WC).astype(jnp.float32)
    b2 = jnp.tile(params["bias2"], W).reshape(1, WC).astype(jnp.float32)

    Bb = _pick_batch_block(B, H)
    kernel = functools.partial(_basic_block_kernel, Bb=Bb, H=H, WC=WC,
                               dilation=dilation)

    out = pl.pallas_call(
        kernel,
        out_shape=jax.ShapeDtypeStruct((B * H, WC), x_nchw.dtype),
        grid_spec=pltpu.PrefetchScalarGridSpec(
            num_scalar_prefetch=0,
            grid=(B // Bb,),
            in_specs=[
                pl.BlockSpec((Bb * H, WC), lambda i: (i, 0)),
                pl.BlockSpec((3 * WC, WC), lambda i: (0, 0)),
                pl.BlockSpec((1, WC), lambda i: (0, 0)),
                pl.BlockSpec((1, WC), lambda i: (0, 0)),
                pl.BlockSpec((3 * WC, WC), lambda i: (0, 0)),
                pl.BlockSpec((1, WC), lambda i: (0, 0)),
                pl.BlockSpec((1, WC), lambda i: (0, 0)),
            ],
            out_specs=pl.BlockSpec((Bb * H, WC), lambda i: (i, 0)),
            scratch_shapes=[
                pltpu.VMEM((Bb * H, 3 * WC), compute_dtype),   # conv1 LHS slab
                pltpu.VMEM((Bb * H, 3 * WC), compute_dtype),   # conv2 LHS slab
            ],
        ),
        compiler_params=pltpu.CompilerParams(
            dimension_semantics=("parallel",),
            # Tiny footprint here; re-derive if block sizes grow (v5e scoped
            # default is 16 MiB, v7x physical VMEM is 64 MiB).
            vmem_limit_bytes=32 * 1024 * 1024,
        ),
    )(x, w1, s1, b1, w2, s2, b2)

    return jnp.transpose(out.reshape(B, H, W, C), (0, 3, 1, 2))


# ---------------------------------------------------------------------------
# Pure-JAX reference (lax conv) for correctness checking.
# ---------------------------------------------------------------------------
def _ref_forward(x_nchw, w1_oihw, s1, b1, w2_oihw, s2, b2, *, pad, dilation):
    eff_pad = dilation if dilation > 1 else pad

    def convbn_eval(x, w, s, b):
        y = lax.conv_general_dilated(
            x, w, window_strides=(1, 1),
            padding=((eff_pad, eff_pad), (eff_pad, eff_pad)),
            rhs_dilation=(dilation, dilation),
            dimension_numbers=("NCHW", "OIHW", "NCHW"))
        return y * s[None, :, None, None] + b[None, :, None, None]

    out = jnp.maximum(convbn_eval(x_nchw, w1_oihw, s1, b1), 0.0)
    out = convbn_eval(out, w2_oihw, s2, b2)
    return out + x_nchw


def _fold_bn(gamma, beta, mean, var, eps=1e-5):
    scale = gamma / jnp.sqrt(var + eps)
    bias = beta - mean * scale
    return scale, bias


if __name__ == "__main__":
    key = jax.random.PRNGKey(0)
    B, C, H, W = 2, 8, 16, 16            # inplanes = planes = 8, stride = 1
    planes = C

    ks = jax.random.split(key, 11)
    x = jax.random.normal(ks[0], (B, C, H, W), jnp.float32)

    # conv weights (PyTorch OIHW) + BN params -- deterministic synthetic init.
    w1_oihw = jax.random.normal(ks[1], (planes, C, 3, 3), jnp.float32) * 0.1
    w2_oihw = jax.random.normal(ks[2], (planes, planes, 3, 3), jnp.float32) * 0.1

    g1 = jax.random.uniform(ks[3], (planes,), minval=0.8, maxval=1.2)
    be1 = jax.random.normal(ks[4], (planes,)) * 0.1
    m1 = jax.random.normal(ks[5], (planes,)) * 0.05
    v1 = jax.random.uniform(ks[6], (planes,), minval=0.5, maxval=1.5)

    g2 = jax.random.uniform(ks[7], (planes,), minval=0.8, maxval=1.2)
    be2 = jax.random.normal(ks[8], (planes,)) * 0.1
    m2 = jax.random.normal(ks[9], (planes,)) * 0.05
    v2 = jax.random.uniform(ks[10], (planes,), minval=0.5, maxval=1.5)

    scale1, bias1 = _fold_bn(g1, be1, m1, v1)
    scale2, bias2 = _fold_bn(g2, be2, m2, v2)

    params = {
        "w1": jnp.transpose(w1_oihw, (2, 3, 1, 0)),   # OIHW -> HWIO
        "w2": jnp.transpose(w2_oihw, (2, 3, 1, 0)),
        "scale1": scale1, "bias1": bias1,
        "scale2": scale2, "bias2": bias2,
    }

    # PSMNet uses both dilation=1 and dilation=2 BasicBlocks.
    for pad, dilation in ((1, 1), (1, 2)):
        ref = _ref_forward(x, w1_oihw, scale1, bias1, w2_oihw, scale2, bias2,
                           pad=pad, dilation=dilation)

        # Exact path (f32 operands): tight tolerance verifies band/slab logic.
        out32 = basic_block_forward(x, params, pad=pad, dilation=dilation,
                                    compute_dtype=jnp.float32)
        out32 = jax.block_until_ready(out32)
        assert out32.shape == (B, planes, H, W)
        err32 = float(jnp.max(jnp.abs(out32 - ref)))
        assert jnp.allclose(out32, ref, atol=1e-4, rtol=1e-4), \
            ("f32", pad, dilation, err32)

        # Fast MXU path (bf16 operands, f32 accumulation): looser tolerance.
        out16 = basic_block_forward(x, params, pad=pad, dilation=dilation,
                                    compute_dtype=jnp.bfloat16)
        out16 = jax.block_until_ready(out16)
        assert out16.shape == (B, planes, H, W)
        err16 = float(jnp.max(jnp.abs(out16 - ref)))
        assert err16 < 0.3, ("bf16", pad, dilation, err16)

    print("KERNEL_OK")
</pallas_src>

<mosaic_0001>
module attributes {stable_mosaic.version = 11 : i64} {
  func.func @_basic_block_kernel(%arg0: i32, %arg1: memref<32x128xf32, #tpu.memory_space<vmem>>, %arg2: memref<384x128xf32, #tpu.memory_space<vmem>>, %arg3: memref<1x128xf32, #tpu.memory_space<vmem>>, %arg4: memref<1x128xf32, #tpu.memory_space<vmem>>, %arg5: memref<384x128xf32, #tpu.memory_space<vmem>>, %arg6: memref<1x128xf32, #tpu.memory_space<vmem>>, %arg7: memref<1x128xf32, #tpu.memory_space<vmem>>, %arg8: memref<32x128xf32, #tpu.memory_space<vmem>>, %arg9: memref<32x384xf32, #tpu.memory_space<vmem>>, %arg10: memref<32x384xf32, #tpu.memory_space<vmem>>) attributes {dimension_semantics = [#tpu.dimension_semantics<parallel>], iteration_bounds = array<i64: 1>, scalar_prefetch = 0 : i64, scratch_operands = 2 : i64, tpu.core_type = #tpu.core_type<tc>, window_params = [{transform_indices = @transform_0, window_bounds = array<i64: 32, 128>}, {pipeline_mode = #tpu.pipeline_mode<synchronous>, transform_indices = @transform_1, window_bounds = array<i64: 384, 128>}, {pipeline_mode = #tpu.pipeline_mode<synchronous>, transform_indices = @transform_2, window_bounds = array<i64: 1, 128>}, {pipeline_mode = #tpu.pipeline_mode<synchronous>, transform_indices = @transform_3, window_bounds = array<i64: 1, 128>}, {pipeline_mode = #tpu.pipeline_mode<synchronous>, transform_indices = @transform_4, window_bounds = array<i64: 384, 128>}, {pipeline_mode = #tpu.pipeline_mode<synchronous>, transform_indices = @transform_5, window_bounds = array<i64: 1, 128>}, {pipeline_mode = #tpu.pipeline_mode<synchronous>, transform_indices = @transform_6, window_bounds = array<i64: 1, 128>}, {transform_indices = @transform_7, window_bounds = array<i64: 32, 128>}]} {
    %c0_i32 = arith.constant 0 : i32
    %0 = arith.cmpi eq, %arg0, %c0_i32 : i32
    %1 = arith.extui %0 : i1 to i32
    %c0_i32_0 = arith.constant 0 : i32
    %2 = arith.cmpi ne, %1, %c0_i32_0 : i32
    scf.if %2 {
      %cst_41 = arith.constant 0.000000e+00 : f32
      %50 = vector.broadcast %cst_41 : f32 to vector<1x128xf32>
      %c0_42 = arith.constant 0 : index
      %c0_43 = arith.constant 0 : index
      %51 = vector.load %arg9[%c0_42, %c0_43] : memref<32x384xf32, #tpu.memory_space<vmem>>, vector<1x128xf32>
      tpu.vector_store %arg9[%c0_42, %c0_43], %50 {strides = array<i32>} : memref<32x384xf32, #tpu.memory_space<vmem>>, vector<1x128xf32>,
      %c15 = arith.constant 15 : index
      %c256_44 = arith.constant 256 : index
      %52 = vector.load %arg9[%c15, %c256_44] : memref<32x384xf32, #tpu.memory_space<vmem>>, vector<1x128xf32>
      tpu.vector_store %arg9[%c15, %c256_44], %50 {strides = array<i32>} : memref<32x384xf32, #tpu.memory_space<vmem>>, vector<1x128xf32>,
      %c0_45 = arith.constant 0 : index
      %c0_46 = arith.constant 0 : index
      %53 = vector.load %arg10[%c0_45, %c0_46] : memref<32x384xf32, #tpu.memory_space<vmem>>, vector<1x128xf32>
      tpu.vector_store %arg10[%c0_45, %c0_46], %50 {strides = array<i32>} : memref<32x384xf32, #tpu.memory_space<vmem>>, vector<1x128xf32>,
      %c15_47 = arith.constant 15 : index
      %c256_48 = arith.constant 256 : index
      %54 = vector.load %arg10[%c15_47, %c256_48] : memref<32x384xf32, #tpu.memory_space<vmem>>, vector<1x128xf32>
      tpu.vector_store %arg10[%c15_47, %c256_48], %50 {strides = array<i32>} : memref<32x384xf32, #tpu.memory_space<vmem>>, vector<1x128xf32>,
      %c16_49 = arith.constant 16 : index
      %c0_50 = arith.constant 0 : index
      %55 = vector.load %arg9[%c16_49, %c0_50] : memref<32x384xf32, #tpu.memory_space<vmem>>, vector<1x128xf32>
      tpu.vector_store %arg9[%c16_49, %c0_50], %50 {strides = array<i32>} : memref<32x384xf32, #tpu.memory_space<vmem>>, vector<1x128xf32>,
      %c31 = arith.constant 31 : index
      %c256_51 = arith.constant 256 : index
      %56 = vector.load %arg9[%c31, %c256_51] : memref<32x384xf32, #tpu.memory_space<vmem>>, vector<1x128xf32>
      tpu.vector_store %arg9[%c31, %c256_51], %50 {strides = array<i32>} : memref<32x384xf32, #tpu.memory_space<vmem>>, vector<1x128xf32>,
      %c16_52 = arith.constant 16 : index
      %c0_53 = arith.constant 0 : index
      %57 = vector.load %arg10[%c16_52, %c0_53] : memref<32x384xf32, #tpu.memory_space<vmem>>, vector<1x128xf32>
      tpu.vector_store %arg10[%c16_52, %c0_53], %50 {strides = array<i32>} : memref<32x384xf32, #tpu.memory_space<vmem>>, vector<1x128xf32>,
      %c31_54 = arith.constant 31 : index
      %c256_55 = arith.constant 256 : index
      %58 = vector.load %arg10[%c31_54, %c256_55] : memref<32x384xf32, #tpu.memory_space<vmem>>, vector<1x128xf32>
      tpu.vector_store %arg10[%c31_54, %c256_55], %50 {strides = array<i32>} : memref<32x384xf32, #tpu.memory_space<vmem>>, vector<1x128xf32>,
    } else {
    }
    %c0 = arith.constant 0 : index
    %c0_1 = arith.constant 0 : index
    %3 = vector.load %arg1[%c0, %c0_1] : memref<32x128xf32, #tpu.memory_space<vmem>>, vector<32x128xf32>
    %4 = vector.extract_strided_slice %3 {offsets = [0, 0], sizes = [15, 128], strides = [1, 1]} : vector<32x128xf32> to vector<15x128xf32>
    %c1 = arith.constant 1 : index
    %c0_2 = arith.constant 0 : index
    %5 = vector.load %arg9[%c1, %c0_2] : memref<32x384xf32, #tpu.memory_space<vmem>>, vector<15x128xf32>
    tpu.vector_store %arg9[%c1, %c0_2], %4 {strides = array<i32>} : memref<32x384xf32, #tpu.memory_space<vmem>>, vector<15x128xf32>,
    %6 = vector.extract_strided_slice %3 {offsets = [0, 0], sizes = [16, 128], strides = [1, 1]} : vector<32x128xf32> to vector<16x128xf32>
    %c0_3 = arith.constant 0 : index
    %c128 = arith.constant 128 : index
    %7 = vector.load %arg9[%c0_3, %c128] : memref<32x384xf32, #tpu.memory_space<vmem>>, vector<16x128xf32>
    tpu.vector_store %arg9[%c0_3, %c128], %6 {strides = array<i32>} : memref<32x384xf32, #tpu.memory_space<vmem>>, vector<16x128xf32>,
    %8 = vector.extract_strided_slice %3 {offsets = [1, 0], sizes = [15, 128], strides = [1, 1]} : vector<32x128xf32> to vector<15x128xf32>
    %c0_4 = arith.constant 0 : index
    %c256 = arith.constant 256 : index
    %9 = vector.load %arg9[%c0_4, %c256] : memref<32x384xf32, #tpu.memory_space<vmem>>, vector<15x128xf32>
    tpu.vector_store %arg9[%c0_4, %c256], %8 {strides = array<i32>} : memref<32x384xf32, #tpu.memory_space<vmem>>, vector<15x128xf32>,
    %10 = vector.extract_strided_slice %3 {offsets = [16, 0], sizes = [15, 128], strides = [1, 1]} : vector<32x128xf32> to vector<15x128xf32>
    %c17 = arith.constant 17 : index
    %c0_5 = arith.constant 0 : index
    %11 = vector.load %arg9[%c17, %c0_5] : memref<32x384xf32, #tpu.memory_space<vmem>>, vector<15x128xf32>
    tpu.vector_store %arg9[%c17, %c0_5], %10 {strides = array<i32>} : memref<32x384xf32, #tpu.memory_space<vmem>>, vector<15x128xf32>,
    %12 = vector.extract_strided_slice %3 {offsets = [16, 0], sizes = [16, 128], strides = [1, 1]} : vector<32x128xf32> to vector<16x128xf32>
    %c16 = arith.constant 16 : index
    %c128_6 = arith.constant 128 : index
    %13 = vector.load %arg9[%c16, %c128_6] : memref<32x384xf32, #tpu.memory_space<vmem>>, vector<16x128xf32>
    tpu.vector_store %arg9[%c16, %c128_6], %12 {strides = array<i32>} : memref<32x384xf32, #tpu.memory_space<vmem>>, vector<16x128xf32>,
    %14 = vector.extract_strided_slice %3 {offsets = [17, 0], sizes = [15, 128], strides = [1, 1]} : vector<32x128xf32> to vector<15x128xf32>
    %c16_7 = arith.constant 16 : index
    %c256_8 = arith.constant 256 : index
    %15 = vector.load %arg9[%c16_7, %c256_8] : memref<32x384xf32, #tpu.memory_space<vmem>>, vector<15x128xf32>
    tpu.vector_store %arg9[%c16_7, %c256_8], %14 {strides = array<i32>} : memref<32x384xf32, #tpu.memory_space<vmem>>, vector<15x128xf32>,
    %c0_9 = arith.constant 0 : index
    %c0_10 = arith.constant 0 : index
    %16 = vector.load %arg9[%c0_9, %c0_10] : memref<32x384xf32, #tpu.memory_space<vmem>>, vector<32x384xf32>
    %c0_11 = arith.constant 0 : index
    %c0_12 = arith.constant 0 : index
    %17 = vector.load %arg2[%c0_11, %c0_12] : memref<384x128xf32, #tpu.memory_space<vmem>>, vector<384x128xf32>
    %cst = arith.constant dense<0.000000e+00> : vector<32x128xf32>
    %18 = tpu.matmul %16, %17, %cst {dimension_numbers = #tpu.dot_dimension_numbers<[1], [0], [0], [1], [0, 0, 1, 1], [], []>} : vector<32x384xf32>, vector<384x128xf32>, vector<32x128xf32> -> vector<32x128xf32>
    %c0_13 = arith.constant 0 : index
    %c0_14 = arith.constant 0 : index
    %19 = vector.load %arg3[%c0_13, %c0_14] : memref<1x128xf32, #tpu.memory_space<vmem>>, vector<1x128xf32>
    %20 = vector.broadcast %19 : vector<1x128xf32> to vector<32x128xf32>
    %21 = arith.mulf %18, %20 : vector<32x128xf32>
    %c0_15 = arith.constant 0 : index
    %c0_16 = arith.constant 0 : index
    %22 = vector.load %arg4[%c0_15, %c0_16] : memref<1x128xf32, #tpu.memory_space<vmem>>, vector<1x128xf32>
    %23 = vector.broadcast %22 : vector<1x128xf32> to vector<32x128xf32>
    %24 = arith.addf %21, %23 : vector<32x128xf32>
    %cst_17 = arith.constant 0.000000e+00 : f32
    %25 = vector.broadcast %cst_17 : f32 to vector<32x128xf32>
    %26 = arith.maximumf %24, %25 : vector<32x128xf32>
    %27 = vector.extract_strided_slice %26 {offsets = [0, 0], sizes = [15, 128], strides = [1, 1]} : vector<32x128xf32> to vector<15x128xf32>
    %c1_18 = arith.constant 1 : index
    %c0_19 = arith.constant 0 : index
    %28 = vector.load %arg10[%c1_18, %c0_19] : memref<32x384xf32, #tpu.memory_space<vmem>>, vector<15x128xf32>
    tpu.vector_store %arg10[%c1_18, %c0_19], %27 {strides = array<i32>} : memref<32x384xf32, #tpu.memory_space<vmem>>, vector<15x128xf32>,
    %29 = vector.extract_strided_slice %26 {offsets = [0, 0], sizes = [16, 128], strides = [1, 1]} : vector<32x128xf32> to vector<16x128xf32>
    %c0_20 = arith.constant 0 : index
    %c128_21 = arith.constant 128 : index
    %30 = vector.load %arg10[%c0_20, %c128_21] : memref<32x384xf32, #tpu.memory_space<vmem>>, vector<16x128xf32>
    tpu.vector_store %arg10[%c0_20, %c128_21], %29 {strides = array<i32>} : memref<32x384xf32, #tpu.memory_space<vmem>>, vector<16x128xf32>,
    %31 = vector.extract_strided_slice %26 {offsets = [1, 0], sizes = [15, 128], strides = [1, 1]} : vector<32x128xf32> to vector<15x128xf32>
    %c0_22 = arith.constant 0 : index
    %c256_23 = arith.constant 256 : index
    %32 = vector.load %arg10[%c0_22, %c256_23] : memref<32x384xf32, #tpu.memory_space<vmem>>, vector<15x128xf32>
    tpu.vector_store %arg10[%c0_22, %c256_23], %31 {strides = array<i32>} : memref<32x384xf32, #tpu.memory_space<vmem>>, vector<15x128xf32>,
    %33 = vector.extract_strided_slice %26 {offsets = [16, 0], sizes = [15, 128], strides = [1, 1]} : vector<32x128xf32> to vector<15x128xf32>
    %c17_24 = arith.constant 17 : index
    %c0_25 = arith.constant 0 : index
    %34 = vector.load %arg10[%c17_24, %c0_25] : memref<32x384xf32, #tpu.memory_space<vmem>>, vector<15x128xf32>
    tpu.vector_store %arg10[%c17_24, %c0_25], %33 {strides = array<i32>} : memref<32x384xf32, #tpu.memory_space<vmem>>, vector<15x128xf32>,
    %35 = vector.extract_strided_slice %26 {offsets = [16, 0], sizes = [16, 128], strides = [1, 1]} : vector<32x128xf32> to vector<16x128xf32>
    %c16_26 = arith.constant 16 : index
    %c128_27 = arith.constant 128 : index
    %36 = vector.load %arg10[%c16_26, %c128_27] : memref<32x384xf32, #tpu.memory_space<vmem>>, vector<16x128xf32>
    tpu.vector_store %arg10[%c16_26, %c128_27], %35 {strides = array<i32>} : memref<32x384xf32, #tpu.memory_space<vmem>>, vector<16x128xf32>,
    %37 = vector.extract_strided_slice %26 {offsets = [17, 0], sizes = [15, 128], strides = [1, 1]} : vector<32x128xf32> to vector<15x128xf32>
    %c16_28 = arith.constant 16 : index
    %c256_29 = arith.constant 256 : index
    %38 = vector.load %arg10[%c16_28, %c256_29] : memref<32x384xf32, #tpu.memory_space<vmem>>, vector<15x128xf32>
    tpu.vector_store %arg10[%c16_28, %c256_29], %37 {strides = array<i32>} : memref<32x384xf32, #tpu.memory_space<vmem>>, vector<15x128xf32>,
    %c0_30 = arith.constant 0 : index
    %c0_31 = arith.constant 0 : index
    %39 = vector.load %arg10[%c0_30, %c0_31] : memref<32x384xf32, #tpu.memory_space<vmem>>, vector<32x384xf32>
    %c0_32 = arith.constant 0 : index
    %c0_33 = arith.constant 0 : index
    %40 = vector.load %arg5[%c0_32, %c0_33] : memref<384x128xf32, #tpu.memory_space<vmem>>, vector<384x128xf32>
    %cst_34 = arith.constant dense<0.000000e+00> : vector<32x128xf32>
    %41 = tpu.matmul %39, %40, %cst_34 {dimension_numbers = #tpu.dot_dimension_numbers<[1], [0], [0], [1], [0, 0, 1, 1], [], []>} : vector<32x384xf32>, vector<384x128xf32>, vector<32x128xf32> -> vector<32x128xf32>
    %c0_35 = arith.constant 0 : index
    %c0_36 = arith.constant 0 : index
    %42 = vector.load %arg6[%c0_35, %c0_36] : memref<1x128xf32, #tpu.memory_space<vmem>>, vector<1x128xf32>
    %43 = vector.broadcast %42 : vector<1x128xf32> to vector<32x128xf32>
    %44 = arith.mulf %41, %43 : vector<32x128xf32>
    %c0_37 = arith.constant 0 : index
    %c0_38 = arith.constant 0 : index
    %45 = vector.load %arg7[%c0_37, %c0_38] : memref<1x128xf32, #tpu.memory_space<vmem>>, vector<1x128xf32>
    %46 = vector.broadcast %45 : vector<1x128xf32> to vector<32x128xf32>
    %47 = arith.addf %44, %46 : vector<32x128xf32>
    %48 = arith.addf %47, %3 : vector<32x128xf32>
    %c0_39 = arith.constant 0 : index
    %c0_40 = arith.constant 0 : index
    %49 = vector.load %arg8[%c0_39, %c0_40] : memref<32x128xf32, #tpu.memory_space<vmem>>, vector<32x128xf32>
    tpu.vector_store %arg8[%c0_39, %c0_40], %48 {strides = array<i32>} : memref<32x128xf32, #tpu.memory_space<vmem>>, vector<32x128xf32>,
    return
  }
  func.func @transform_0(%arg0: i32) -> (i32, i32) {
    %c0_i32 = arith.constant 0 : i32
    %c0_i32_0 = arith.constant 0 : i32
    return %arg0, %c0_i32 : i32, i32
  }
  func.func @transform_1(%arg0: i32) -> (i32, i32) {
    %c0_i32 = arith.constant 0 : i32
    %c0_i32_0 = arith.constant 0 : i32
    %c0_i32_1 = arith.constant 0 : i32
    return %c0_i32, %c0_i32_0 : i32, i32
  }
  func.func @transform_2(%arg0: i32) -> (i32, i32) {
    %c0_i32 = arith.constant 0 : i32
    %c0_i32_0 = arith.constant 0 : i32
    %c0_i32_1 = arith.constant 0 : i32
    return %c0_i32, %c0_i32_0 : i32, i32
  }
  func.func @transform_3(%arg0: i32) -> (i32, i32) {
    %c0_i32 = arith.constant 0 : i32
    %c0_i32_0 = arith.constant 0 : i32
    %c0_i32_1 = arith.constant 0 : i32
    return %c0_i32, %c0_i32_0 : i32, i32
  }
  func.func @transform_4(%arg0: i32) -> (i32, i32) {
    %c0_i32 = arith.constant 0 : i32
    %c0_i32_0 = arith.constant 0 : i32
    %c0_i32_1 = arith.constant 0 : i32
    return %c0_i32, %c0_i32_0 : i32, i32
  }
  func.func @transform_5(%arg0: i32) -> (i32, i32) {
    %c0_i32 = arith.constant 0 : i32
    %c0_i32_0 = arith.constant 0 : i32
    %c0_i32_1 = arith.constant 0 : i32
    return %c0_i32, %c0_i32_0 : i32, i32
  }
  func.func @transform_6(%arg0: i32) -> (i32, i32) {
    %c0_i32 = arith.constant 0 : i32
    %c0_i32_0 = arith.constant 0 : i32
    %c0_i32_1 = arith.constant 0 : i32
    return %c0_i32, %c0_i32_0 : i32, i32
  }
  func.func @transform_7(%arg0: i32) -> (i32, i32) {
    %c0_i32 = arith.constant 0 : i32
    %c0_i32_0 = arith.constant 0 : i32
    return %arg0, %c0_i32 : i32, i32
  }
}

</mosaic_0001>

<bundles_post_ra>
// kernel: tpu_custom_call.1
= control target key start
LH: loop header
LB: loop body
LE: loop exit
PB: predicated region body
PF: predicated region fallthrough
CT: control target
= control target key end

     0   :  { %12 = vsyncpa [#allocation5], 0  ;;  %s1293_s0 = inlined_call_operand.hbm [shape: f32[32,128], index: 0, kind: input, shape index: {}]   ;;  %s1294_s1 = inlined_call_operand.hbm [shape: f32[384,128], index: 1, kind: input, shape index: {}]   ;;  %s1295_s2 = inlined_call_operand.vmem [shape: f32[1,128], index: 2, kind: input, shape index: {}]   ;;  %s1296_s3 = inlined_call_operand.vmem [shape: f32[1,128], index: 3, kind: input, shape index: {}]   ;;  %s1297_s4 = inlined_call_operand.hbm [shape: f32[384,128], index: 4, kind: input, shape index: {}]   ;;  %s1298_s5 = inlined_call_operand.vmem [shape: f32[1,128], index: 5, kind: input, shape index: {}]   ;;  %s1299_s6 = inlined_call_operand.vmem [shape: f32[1,128], index: 6, kind: input, shape index: {}]   ;;  %s1300_s7 = inlined_call_operand.hbm [shape: f32[32,128], index: 7, kind: output, shape index: {}]  }
   0x1   :  { %13 = vsyncpa [#allocation8], 0 }
   0x2   :  { %14 = vsyncpa [#allocation6], 0  ;;  %s1129_s24 = smov [#allocation7]   ;;  %s1130_s26 = smov [#allocation4]  }
   0x3   :  { %s32_s25 = sshll.u32 %s1129_s24, 4  ;;  %s20_s27 = sshll.u32 %s1130_s26, 4  ;;  %s33_s25 = int_to_ptr.vmem [resolvable:$true] %s32_s25  ;;  %s1176_s27 = int_to_ptr.vmem [resolvable:$true] %s20_s27 }
   0x4   :  { %s1035_s30 = scalar_lea.hbm %s1294_s1, 6144 }
   0x5   :  { %p1036_p0 = scmp.ne.s32.totalorder %s1294_s1, %s1035_s30  ;;  %p1039_p1 = scmp.lt.u32.totalorder %s1035_s30, %s1294_s1 }
   0x7   :  { %p1041_p2 = pnand %p1039_p1, %p1036_p0 }
   0x9   :  { %1044 = shalt.err (!%p1041_p2)
}
   0xa   :  { %s1045_s12 = scalar_lea.vmem %s33_s25, 6144  ;;  %p1050_p4 = scmp.lt.s32.totalorder %s33_s25, %s33_s25 }
   0xb   :  { %p1046_p3 = scmp.ne.s32.totalorder %s33_s25, %s1045_s12  ;;  %p1051_p5 = scmp.lt.s32.totalorder %s1045_s12, %s1045_s12 }
   0xd   :  { %p1052_p6 = por %p1051_p5, %p1050_p4 }
   0xf   :  { %p1053_p7 = pnand %p1052_p6, %p1046_p3 }
  0x11   :  { %1056 = shalt.err (!%p1053_p7)
}
  0x12   :  { %s1131_s13 = smov 128   ;;  %s1132_s14 = smov 8  }
  0x13   :  { %38 = dma.hbm_to_vmem [thread:$0]  %s1294_s1, 6144, %s33_s25, [#allocation8], %s1131_s13, %s1131_s13, %s1132_s14  }
  0x14   :  { %s1057_s19 = scalar_lea.hbm %s1293_s0, 512 }
  0x15   :  { %p1058_p8 = scmp.ne.s32.totalorder %s1293_s0, %s1057_s19  ;;  %p1061_p9 = scmp.lt.u32.totalorder %s1057_s19, %s1293_s0 }
  0x17   :  { %p1063_p10 = pnand %p1061_p9, %p1058_p8 }
  0x19   :  { %1066 = shalt.err (!%p1063_p10)
}
  0x1a   :  { %s1067_s24 = scalar_lea.vmem %s1176_s27, 512  ;;  %p1072_p12 = scmp.lt.s32.totalorder %s1176_s27, %s1176_s27 }
  0x1b   :  { %p1068_p11 = scmp.ne.s32.totalorder %s1176_s27, %s1067_s24  ;;  %p1073_p13 = scmp.lt.s32.totalorder %s1067_s24, %s1067_s24 }
  0x1d   :  { %p1074_p0 = por %p1073_p13, %p1072_p12 }
  0x1f   :  { %p1075_p1 = pnand %p1074_p0, %p1068_p11 }
  0x21   :  { %1078 = shalt.err (!%p1075_p1)
}
  0x22   :  { %26 = dma.hbm_to_vmem [thread:$0]  %s1293_s0, 512, %s1176_s27, [#allocation5], %s1131_s13, %s1131_s13, %s1132_s14  }
  0x23   :  { %s1133_s26 = smov [#allocation9]   ;;  %s1079_s8 = scalar_lea.hbm %s1297_s4, 6144 }
  0x24   :  { %s48_s28 = sshll.u32 %s1133_s26, 4  ;;  %p1080_p2 = scmp.ne.s32.totalorder %s1297_s4, %s1079_s8  ;;  %s49_s28 = int_to_ptr.vmem [resolvable:$true] %s48_s28 }
  0x25   :  { %p1083_p3 = scmp.lt.u32.totalorder %s1079_s8, %s1297_s4 }
  0x27   :  { %p1085_p4 = pnand %p1083_p3, %p1080_p2 }
  0x29   :  { %1088 = shalt.err (!%p1085_p4)
}
  0x2a   :  { %s1089_s15 = scalar_lea.vmem %s49_s28, 6144  ;;  %p1094_p6 = scmp.lt.s32.totalorder %s49_s28, %s49_s28 }
  0x2b   :  { %p1090_p5 = scmp.ne.s32.totalorder %s49_s28, %s1089_s15  ;;  %p1095_p7 = scmp.lt.s32.totalorder %s1089_s15, %s1089_s15 }
  0x2d   :  { %p1096_p8 = por %p1095_p7, %p1094_p6 }
  0x2f   :  { %p1097_p9 = pnand %p1096_p8, %p1090_p5 }
  0x31   :  { %1100 = shalt.err (!%p1097_p9)
}
  0x32   :  { %54 = dma.hbm_to_vmem [thread:$0]  %s1297_s4, 6144, %s49_s28, [#allocation8], %s1131_s13, %s1131_s13, %s1132_s14  }
  0x33   :  { %1123 = dma.done.wait [#allocation5], 512  }
  0x34   :  { %1124 = vsyncadd [#allocation5], 4294966784 }
  0x35   :  { %1125 = dma.done.wait [#allocation8], 12288  }
  0x36   :  { %1126 = vsyncadd [#allocation8], 4294955008  ;;  %v1134_v0 = vmov 0.0   ;;  %v150_v1 = vld [vmem:[#allocation7 + $0x80] sm:$0xff]  ;;  %v151_v2 = vld [vmem:[#allocation7 + $0x88] sm:$0xff]  ;;  %vm96_vm0 = vcmask 1046528  }
  0x37   :  { %72 = vst [vmem:[#allocation2] sm:$0x1] %v1134_v0  ;;  %73 = vst [vmem:[#allocation2 + $0x2f] sm:$0x1] %v1134_v0  ;;  %v134_v3 = vld [vmem:[#allocation7] sm:$0xff]  ;;  %v900_v4 = vpack.c.bf16 %v151_v2, %v150_v1  ;;  %v135_v5 = vld [vmem:[#allocation7 + $0x8] sm:$0xff] }
  0x38   :  { %74 = vst [vmem:[#allocation3] sm:$0x1] %v1134_v0  ;;  %75 = vst [vmem:[#allocation3 + $0x2f] sm:$0x1] %v1134_v0  ;;  %v166_v6 = vld [vmem:[#allocation7 + $0x100] sm:$0xff]  ;;  %v167_v7 = vld [vmem:[#allocation7 + $0x108] sm:$0xff]  ;;  %v902_v8 = vpack.c.bf16 %v135_v5, %v134_v3 }
  0x39   :  { %76 = vst [vmem:[#allocation2 + $0x30] sm:$0x1] %v1134_v0  ;;  %77 = vst [vmem:[#allocation2 + $0x5f] sm:$0x1] %v1134_v0  ;;  %v932_v9 = vpack.c.bf16 %v167_v7, %v166_v6  ;;  %v152_v10 = vld [vmem:[#allocation7 + $0x90] sm:$0xff]  ;;  %v153_v11 = vld [vmem:[#allocation7 + $0x98] sm:$0xff]  ;;  %901 = vmatprep.subr.bf16.mxu0 %v900_v4 }
  0x3a   :  { %78 = vst [vmem:[#allocation3 + $0x30] sm:$0x1] %v1134_v0  ;;  %79 = vst [vmem:[#allocation3 + $0x5f] sm:$0x1] %v1134_v0  ;;  %v136_v12 = vld [vmem:[#allocation7 + $0x10] sm:$0xff]  ;;  %v904_v13 = vpack.c.bf16 %v153_v11, %v152_v10  ;;  %v137_v14 = vld [vmem:[#allocation7 + $0x18] sm:$0xff]  ;;  %903 = vmatpush3.bf16.msra.mxu0 %v902_v8 }
  0x3b   :  { %v168_v15 = vld [vmem:[#allocation7 + $0x110] sm:$0xff]  ;;  %v169_v16 = vld [vmem:[#allocation7 + $0x118] sm:$0xff]  ;;  %933 = vmatprep.subr.bf16.mxu1 %v932_v9  ;;  %v906_v17 = vpack.c.bf16 %v137_v14, %v136_v12  ;;  %v154_v19 = vld [vmem:[#allocation7 + $0xa0] sm:$0xff]  ;;  %vm86_vm1 = vcmask 1040384  }
  0x3c   :  { %v936_v18 = vpack.c.bf16 %v169_v16, %v168_v15  ;;  %v155_v20 = vld [vmem:[#allocation7 + $0xa8] sm:$0xff]  ;;  %v138_v21 = vld [vmem:[#allocation7 + $0x20] sm:$0xff]  ;;  %935 = vmatpush3.bf16.msra.mxu1 %v932_v9  ;;  %905 = vmatprep.subr.bf16.mxu0 %v904_v13  ;;  %v156_v27 = vld [vmem:[#allocation7 + $0xb0] sm:$0xff] }
  0x3d   :  { %v908_v22 = vpack.c.bf16 %v155_v20, %v154_v19  ;;  %v139_v23 = vld [vmem:[#allocation7 + $0x28] sm:$0xff]  ;;  %v170_v24 = vld [vmem:[#allocation7 + $0x120] sm:$0xff]  ;;  %v157_v28 = vld [vmem:[#allocation7 + $0xb8] sm:$0xff] }
  0x3e   :  { %v171_v25 = vld [vmem:[#allocation7 + $0x128] sm:$0xff]  ;;  %937 = vmatprep.subr.bf16.mxu1 %v936_v18  ;;  %v172_v29 = vld [vmem:[#allocation7 + $0x130] sm:$0xff]  ;;  %v173_v30 = vld [vmem:[#allocation7 + $0x138] sm:$0xff]  ;;  %907 = vmatpush3.bf16.msra.mxu0 %v906_v17  ;;  %v910_v31 = vpack.c.bf16 %v139_v23, %v138_v21  ;;  %v912_v32 = vpack.c.bf16 %v157_v28, %v156_v27 }
  0x3f   :  { %v940_v26 = vpack.c.bf16 %v171_v25, %v170_v24  ;;  %909 = vmatprep.subr.bf16.mxu0 %v908_v22  ;;  %v140_v33 = vld [vmem:[#allocation7 + $0x30] sm:$0xff]  ;;  %v141_v34 = vld [vmem:[#allocation7 + $0x38] sm:$0xff]  ;;  %v944_v35 = vpack.c.bf16 %v173_v30, %v172_v29  ;;  %v158_v36 = vld [vmem:[#allocation7 + $0xc0] sm:$0xff] }
  0x40   :  { %939 = vmatpush3.bf16.msra.mxu1 %v936_v18  ;;  %v159_v37 = vld [vmem:[#allocation7 + $0xc8] sm:$0xff]  ;;  %v174_v38 = vld [vmem:[#allocation7 + $0x140] sm:$0xff]  ;;  %v914_v40 = vpack.c.bf16 %v141_v34, %v140_v33  ;;  %v160_v43 = vld [vmem:[#allocation7 + $0xd0] sm:$0xff] }
  0x41   :  { %941 = vmatprep.subr.bf16.mxu1 %v940_v26  ;;  %v175_v39 = vld [vmem:[#allocation7 + $0x148] sm:$0xff]  ;;  %v142_v41 = vld [vmem:[#allocation7 + $0x40] sm:$0xff]  ;;  %v916_v44 = vpack.c.bf16 %v159_v37, %v158_v36  ;;  %v161_v45 = vld [vmem:[#allocation7 + $0xd8] sm:$0xff] }
  0x42   :  { %911 = vmatpush3.bf16.msra.mxu0 %v910_v31  ;;  %v143_v42 = vld [vmem:[#allocation7 + $0x48] sm:$0xff]  ;;  %v176_v46 = vld [vmem:[#allocation7 + $0x150] sm:$0xff]  ;;  %v177_v47 = vld [vmem:[#allocation7 + $0x158] sm:$0xff]  ;;  %v948_v48 = vpack.c.bf16 %v175_v39, %v174_v38  ;;  %v920_v51 = vpack.c.bf16 %v161_v45, %v160_v43 }
  0x43   :  { %913 = vmatprep.subr.bf16.mxu0 %v912_v32  ;;  %v144_v49 = vld [vmem:[#allocation7 + $0x50] sm:$0xff]  ;;  %v918_v50 = vpack.c.bf16 %v143_v42, %v142_v41  ;;  %v952_v52 = vpack.c.bf16 %v177_v47, %v176_v46  ;;  %v1228_v53 = vld [vmem:[#allocation4] sm:$0xff]  ;;  %v1230_v54 = vld [vmem:[#allocation4 + $0x8] sm:$0xff] }
  0x44   :  { %943 = vmatpush3.bf16.msra.mxu1 %v940_v26  ;;  %v1232_v55 = vld [vmem:[#allocation4 + $0x10] sm:$0xff]  ;;  %v145_v56 = vld [vmem:[#allocation7 + $0x58] sm:$0xff]  ;;  %v87_v57 = vrot.slane %v1228_v53, 7  ;;  %v97_v58 = vrot.slane %v1228_v53, 1  ;;  %v98_v59 = vrot.slane %v1230_v54, 1  ;;  %v88_v60 = vrot.slane %v1230_v54, 7  ;;  %246 = vmatprep.mubr.f32.mxu0 %v1228_v53 }
  0x45   :  { %945 = vmatprep.subr.bf16.mxu1 %v944_v35  ;;  %v1238_v61 = vld [vmem:[#allocation4 + $0x18] sm:$0xff]  ;;  %v162_v62 = vld [vmem:[#allocation7 + $0xe0] sm:$0xff]  ;;  %v163_v63 = vld [vmem:[#allocation7 + $0xe8] sm:$0xff]  ;;  %v106_v0 = vrot.slane %v1232_v55, 7  ;;  %v115_v1 = vrot.slane %v1232_v55, 1  ;;  %v922_v8 = vpack.c.bf16 %v145_v56, %v144_v49 }
  0x46   :  { %915 = vmatpush3.bf16.msra.mxu0 %v914_v40  ;;  %v116_v2 = vrot.slane %v1238_v61, 1  ;;  %v107_v3 = vrot.slane %v1238_v61, 7  ;;  %v178_v4 = vld [vmem:[#allocation7 + $0x160] sm:$0xff]  ;;  %v179_v5 = vld [vmem:[#allocation7 + $0x168] sm:$0xff]  ;;  %92 = vst [vmem:[#allocation2] sm:$0xfe] %v87_v57  ;;  %v99_v6 = vsel %vm96_vm0, %v97_v58, %v98_v59  ;;  %v1247_v7 = vsel %vm86_vm1, %v87_v57, %v88_v60 }
  0x47   :  { %917 = vmatprep.subr.bf16.mxu0 %v916_v44  ;;  %103 = vst [vmem:[#allocation2 + $0x28] sm:$0x7f] %v98_v59  ;;  %856 = vmatprep.mubr.f32.mxu1 %v99_v6  ;;  %111 = vst [vmem:[#allocation2 + $0x30] sm:$0xfe] %v106_v0  ;;  %v924_v11 = vpack.c.bf16 %v163_v63, %v162_v62  ;;  %v146_v12 = vld [vmem:[#allocation7 + $0x60] sm:$0xff]  ;;  %v147_v13 = vld [vmem:[#allocation7 + $0x68] sm:$0xff]  ;;  %v956_v14 = vpack.c.bf16 %v179_v5, %v178_v4 }
  0x48   :  { %947 = vmatpush3.bf16.msra.mxu1 %v944_v35  ;;  %v117_v9 = vsel %vm96_vm0, %v115_v1, %v116_v2  ;;  %121 = vst [vmem:[#allocation2 + $0x58] sm:$0x7f] %v116_v2  ;;  %v1251_v10 = vsel %vm86_vm1, %v106_v0, %v107_v3  ;;  %v164_v15 = vld [vmem:[#allocation7 + $0xf0] sm:$0xff]  ;;  %v165_v16 = vld [vmem:[#allocation7 + $0xf8] sm:$0xff]  ;;  %v926_v19 = vpack.c.bf16 %v147_v13, %v146_v12  ;;  %v442_v24 = vld [vmem:[#allocation9 + $0x80] sm:$0xff] }
  0x49   :  { %949 = vmatprep.subr.bf16.mxu1 %v948_v48  ;;  %v180_v17 = vld [vmem:[#allocation7 + $0x170] sm:$0xff]  ;;  %v181_v18 = vld [vmem:[#allocation7 + $0x178] sm:$0xff]  ;;  %v928_v20 = vpack.c.bf16 %v165_v16, %v164_v15  ;;  %v443_v25 = vld [vmem:[#allocation9 + $0x88] sm:$0xff] }
  0x4a   :  { %919 = vmatpush3.bf16.msra.mxu0 %v918_v50  ;;  %v148_v21 = vld [vmem:[#allocation7 + $0x70] sm:$0xff]  ;;  %v149_v22 = vld [vmem:[#allocation7 + $0x78] sm:$0xff]  ;;  %v960_v23 = vpack.c.bf16 %v181_v18, %v180_v17  ;;  %v458_v26 = vld [vmem:[#allocation9 + $0x100] sm:$0xff]  ;;  %v964_v29 = vpack.c.bf16 %v443_v25, %v442_v24 }
  0x4b   :  { %921 = vmatprep.subr.bf16.mxu0 %v920_v51  ;;  %v459_v27 = vld [vmem:[#allocation9 + $0x108] sm:$0xff]  ;;  %v930_v28 = vpack.c.bf16 %v149_v22, %v148_v21  ;;  %v426_v30 = vld [vmem:[#allocation9] sm:$0xff]  ;;  %v444_v33 = vld [vmem:[#allocation9 + $0x90] sm:$0xff] }
  0x4c   :  { %951 = vmatpush3.bf16.msra.mxu1 %v948_v48  ;;  %v427_v31 = vld [vmem:[#allocation9 + $0x8] sm:$0xff]  ;;  %v996_v32 = vpack.c.bf16 %v459_v27, %v458_v26  ;;  %v445_v34 = vld [vmem:[#allocation9 + $0x98] sm:$0xff]  ;;  %v428_v39 = vld [vmem:[#allocation9 + $0x10] sm:$0xff] }
  0x4d   :  { %953 = vmatprep.subr.bf16.mxu1 %v952_v52  ;;  %v122_v35 = vld [vmem:[#allocation2] sm:$0xff]  ;;  %v966_v37 = vpack.c.bf16 %v427_v31, %v426_v30  ;;  %v968_v38 = vpack.c.bf16 %v445_v34, %v444_v33  ;;  %v429_v40 = vld [vmem:[#allocation9 + $0x18] sm:$0xff]  ;;  %v447_v42 = vld [vmem:[#allocation9 + $0xa8] sm:$0xff] }
  0x4e   :  { %923 = vmatpush3.bf16.msra.mxu0 %v922_v8  ;;  %v127_v36 = vld [vmem:[#allocation2 + $0x28] sm:$0xff]  ;;  %v446_v41 = vld [vmem:[#allocation9 + $0xa0] sm:$0xff]  ;;  %v970_v44 = vpack.c.bf16 %v429_v40, %v428_v39  ;;  %v128_v48 = vld [vmem:[#allocation2 + $0x30] sm:$0xff] }
  0x4f   :  { %925 = vmatprep.subr.bf16.mxu0 %v924_v11  ;;  %v133_v43 = vld [vmem:[#allocation2 + $0x58] sm:$0xff]  ;;  %v972_v45 = vpack.c.bf16 %v447_v42, %v446_v41  ;;  %v430_v46 = vld [vmem:[#allocation9 + $0x20] sm:$0xff]  ;;  %v431_v47 = vld [vmem:[#allocation9 + $0x28] sm:$0xff] }
  0x50   :  { %955 = vmatpush3.bf16.msra.mxu1 %v952_v52  ;;  %v974_v49 = vpack.c.bf16 %v431_v47, %v430_v46  ;;  %v460_v50 = vld [vmem:[#allocation9 + $0x110] sm:$0xff]  ;;  %v461_v51 = vld [vmem:[#allocation9 + $0x118] sm:$0xff]  ;;  %v462_v58 = vld [vmem:[#allocation9 + $0x120] sm:$0xff] }
  0x51   :  { %957 = vmatprep.subr.bf16.mxu1 %v956_v14  ;;  %v1000_v52 = vpack.c.bf16 %v461_v51, %v460_v50  ;;  %v448_v56 = vld [vmem:[#allocation9 + $0xb0] sm:$0xff]  ;;  %v449_v57 = vld [vmem:[#allocation9 + $0xb8] sm:$0xff]  ;;  %v463_v63 = vld [vmem:[#allocation9 + $0x128] sm:$0xff] }
  0x52   :  { %927 = vmatpush3.bf16.msra.mxu0 %v926_v19  ;;  %v976_v59 = vpack.c.bf16 %v449_v57, %v448_v56  ;;  %v432_v60 = vld [vmem:[#allocation9 + $0x30] sm:$0xff]  ;;  %v433_v62 = vld [vmem:[#allocation9 + $0x38] sm:$0xff]  ;;  %v1004_v1 = vpack.c.bf16 %v463_v63, %v462_v58  ;;  %v450_v2 = vld [vmem:[#allocation9 + $0xc0] sm:$0xff] }
  0x53   :  { %929 = vmatprep.subr.bf16.mxu0 %v928_v20  ;;  %v978_v0 = vpack.c.bf16 %v433_v62, %v432_v60  ;;  %v451_v3 = vld [vmem:[#allocation9 + $0xc8] sm:$0xff]  ;;  %v464_v4 = vld [vmem:[#allocation9 + $0x130] sm:$0xff]  ;;  %v434_v6 = vld [vmem:[#allocation9 + $0x40] sm:$0xff] }
  0x54   :  { %959 = vmatpush3.bf16.msra.mxu1 %v956_v14  ;;  %v980_v5 = vpack.c.bf16 %v451_v3, %v450_v2  ;;  %v452_v11 = vld [vmem:[#allocation9 + $0xd0] sm:$0xff]  ;;  %v453_v12 = vld [vmem:[#allocation9 + $0xd8] sm:$0xff]  ;;  %v466_v13 = vld [vmem:[#allocation9 + $0x140] sm:$0xff] }
  0x55   :  { %961 = vmatprep.subr.bf16.mxu1 %v960_v23  ;;  %v984_v14 = vpack.c.bf16 %v453_v12, %v452_v11  ;;  %v436_v15 = vld [vmem:[#allocation9 + $0x50] sm:$0xff]  ;;  %v437_v16 = vld [vmem:[#allocation9 + $0x58] sm:$0xff]  ;;  %v467_v17 = vld [vmem:[#allocation9 + $0x148] sm:$0xff] }
  0x56   :  { %931 = vmatpush3.bf16.msra.mxu0 %v930_v28  ;;  %v986_v18 = vpack.c.bf16 %v437_v16, %v436_v15  ;;  %v1012_v19 = vpack.c.bf16 %v467_v17, %v466_v13  ;;  %v454_v20 = vld [vmem:[#allocation9 + $0xe0] sm:$0xff]  ;;  %v455_v21 = vld [vmem:[#allocation9 + $0xe8] sm:$0xff]  ;;  %v468_v22 = vld [vmem:[#allocation9 + $0x150] sm:$0xff] }
  0x57   :  { %965 = vmatprep.subr.bf16.mxu0 %v964_v29  ;;  %v438_v24 = vld [vmem:[#allocation9 + $0x60] sm:$0xff]  ;;  %v439_v25 = vld [vmem:[#allocation9 + $0x68] sm:$0xff]  ;;  %v469_v26 = vld [vmem:[#allocation9 + $0x158] sm:$0xff] }
  0x58   :  { %963 = vmatpush3.bf16.msra.mxu1 %v960_v23  ;;  %v988_v23 = vpack.c.bf16 %v455_v21, %v454_v20  ;;  %v990_v27 = vpack.c.bf16 %v439_v25, %v438_v24  ;;  %v1016_v28 = vpack.c.bf16 %v469_v26, %v468_v22  ;;  %v456_v29 = vld [vmem:[#allocation9 + $0xf0] sm:$0xff]  ;;  %v457_v30 = vld [vmem:[#allocation9 + $0xf8] sm:$0xff]  ;;  %v470_v31 = vld [vmem:[#allocation9 + $0x160] sm:$0xff] }
  0x59   :  { %997 = vmatprep.subr.bf16.mxu1 %v996_v32  ;;  %247 = vmatmul.mubr.f32.vlgmr.msra.gmra.mrb[0].mxu0 %v122_v35  ;;  %v440_v33 = vld [vmem:[#allocation9 + $0x70] sm:$0xff]  ;;  %v441_v34 = vld [vmem:[#allocation9 + $0x78] sm:$0xff]  ;;  %v471_v35 = vld [vmem:[#allocation9 + $0x168] sm:$0xff] }
  0x5a   :  { %251 = vmatprep.mubr.f32.mxu0 %v1230_v54  ;;  %967 = vmatpush3.bf16.msra.mxu0 %v966_v37  ;;  %v1020_v37 = vpack.c.bf16 %v471_v35, %v470_v31  ;;  %v473_v39 = vld [vmem:[#allocation9 + $0x178] sm:$0xff]  ;;  %v692_v46 = vld [vmem:[%s1295_s2] ss:$0 sm:$0xff] }
  0x5b   :  { %857 = vmatmul.mubr.f32.vlgmr.msra.gmra.mrb[0].mxu1 %v127_v36  ;;  %969 = vmatprep.subr.bf16.mxu0 %v968_v38  ;;  %v994_v36 = vpack.c.bf16 %v441_v34, %v440_v33  ;;  %v472_v38 = vld [vmem:[#allocation9 + $0x170] sm:$0xff] }
  0x5c   :  { %859 = vmatprep.mubr.f32.mxu1 %v117_v9  ;;  %999 = vmatpush3.bf16.msra.mxu1 %v996_v32  ;;  %v465_v9 = vld [vmem:[#allocation9 + $0x138] sm:$0xff]  ;;  %v992_v32 = vpack.c.bf16 %v457_v30, %v456_v29  ;;  %v1024_v40 = vpack.c.bf16 %v473_v39, %v472_v38 }
  0x5d   :  { %252 = vmatmul.mubr.f32.gmra.mrb[2].mxu0 %v1247_v7  ;;  %1001 = vmatprep.subr.bf16.mxu1 %v1000_v52  ;;  %v435_v7 = vld [vmem:[#allocation9 + $0x48] sm:$0xff] }
  0x5e   :  { %256 = vmatprep.mubr.f32.mxu0 %v1232_v55  ;;  %971 = vmatpush3.bf16.msra.mxu0 %v970_v44  ;;  %v982_v8 = vpack.c.bf16 %v435_v7, %v434_v6 }
  0x5f   :  { %860 = vmatmul.mubr.f32.gmra.mrb[2].mxu1 %v133_v43  ;;  %973 = vmatprep.subr.bf16.mxu0 %v972_v45 }
  0x60   :  { %1003 = vmatpush3.bf16.msra.mxu1 %v1000_v52 }
  0x61   :  { %257 = vmatmul.mubr.f32.gmra.mrb[4].mxu0 %v128_v48  ;;  %1005 = vmatprep.subr.bf16.mxu1 %v1004_v1 }
  0x62   :  { %261 = vmatprep.mubr.f32.mxu0 %v1238_v61  ;;  %975 = vmatpush3.bf16.msra.mxu0 %v974_v49  ;;  %v693_v49 = vld [vmem:[%s1296_s3] ss:$0 sm:$0xff] }
  0x63   :  { %977 = vmatprep.subr.bf16.mxu0 %v976_v59 }
  0x64   :  { %1007 = vmatpush3.bf16.msra.mxu1 %v1004_v1 }
  0x65   :  { %262 = vmatmul.mubr.f32.gmra.mrb[6].mxu0 %v1251_v10  ;;  %v1008_v10 = vpack.c.bf16 %v465_v9, %v464_v4 }
  0x66   :  { %979 = vmatpush3.bf16.msra.mxu0 %v978_v0 }
  0x67   :  { %981 = vmatprep.subr.bf16.mxu0 %v980_v5  ;;  %1009 = vmatprep.subr.bf16.mxu1 %v1008_v10 }
  0x68   :  { %1011 = vmatpush3.bf16.msra.mxu1 %v1008_v10 }
  0x69   :  { %1013 = vmatprep.subr.bf16.mxu1 %v1012_v19 }
  0x6a   :  { %983 = vmatpush3.bf16.msra.mxu0 %v982_v8 }
  0x6b   :  { %985 = vmatprep.subr.bf16.mxu0 %v984_v14 }
  0x6c   :  { %1015 = vmatpush3.bf16.msra.mxu1 %v1012_v19 }
  0x6d   :  { %1017 = vmatprep.subr.bf16.mxu1 %v1016_v28 }
  0x6e   :  { %987 = vmatpush3.bf16.msra.mxu0 %v986_v18 }
  0x6f   :  { %989 = vmatprep.subr.bf16.mxu0 %v988_v23 }
  0x70   :  { %1019 = vmatpush3.bf16.msra.mxu1 %v1016_v28 }
  0x71   :  { %1021 = vmatprep.subr.bf16.mxu1 %v1020_v37 }
  0x72   :  { %991 = vmatpush3.bf16.msra.mxu0 %v990_v27 }
  0x73   :  { %993 = vmatprep.subr.bf16.mxu0 %v992_v32 }
  0x74   :  { %1023 = vmatpush3.bf16.msra.mxu1 %v1020_v37  ;;  %v694_v37 = vld [vmem:[%s1298_s5] ss:$0 sm:$0xff]  ;;  %s1135_s5 = smov [#allocation10]  }
  0x75   :  { %1025 = vmatprep.subr.bf16.mxu1 %v1024_v40 }
  0x76   :  { %995 = vmatpush3.bf16.msra.mxu0 %v994_v36 }
  0x78   :  { %1027 = vmatpush3.bf16.msra.mxu1 %v1024_v40 }
 0x12c   :  { %v728_v41 = vpop.f32.mrb[0].mxu0 }
 0x12d   :  { %v729_v42 = vpop.f32.mrb[1].mxu0 }
 0x12e   :  { %v858_v43 = vpop.f32.mrb[0].mxu1  ;;  %v730_v44 = vadd.f32 %v729_v42, %v728_v41  ;;  %v695_v41 = vld [vmem:[%s1299_s6] ss:$0 sm:$0xff]  ;;  %s679_s6 = sshll.u32 %s1135_s5, 4  ;;  %s680_s6 = int_to_ptr.vmem [resolvable:$true] %s679_s6 }
 0x12f   :  { %v333_v45 = vpop.f32.mrb[1].mxu1  ;;  %s1101_s21 = scalar_lea.vmem %s680_s6, 512  ;;  %p1106_p11 = scmp.lt.s32.totalorder %s680_s6, %s680_s6 }
 0x130   :  { %v334_v47 = vadd.f32 %v730_v44, %v333_v45  ;;  %v731_v48 = vpop.f32.mrb[2].mxu0  ;;  %p1102_p10 = scmp.ne.s32.totalorder %s680_s6, %s1101_s21  ;;  %p1107_p12 = scmp.lt.s32.totalorder %s1101_s21, %s1101_s21 }
 0x131   :  { %v732_v50 = vpop.f32.mrb[3].mxu0 }
 0x132   :  { %v861_v51 = vpop.f32.mrb[2].mxu1  ;;  %v359_v52 = vmul.f32 %v692_v46, %v334_v47  ;;  %v733_v56 = vadd.f32 %v732_v50, %v731_v48  ;;  %p1108_p13 = por %p1107_p12, %p1106_p11 }
 0x133   :  { %v343_v57 = vpop.f32.mrb[3].mxu1 }
 0x134   :  { %v370_v58 = vadd.f32 %v693_v49, %v359_v52  ;;  %v339_v59 = vadd.f32 %v858_v43, %v733_v56  ;;  %v734_v60 = vpop.f32.mrb[4].mxu0  ;;  %p1109_p0 = pnand %p1108_p13, %p1102_p10 }
 0x135   :  { %v735_v62 = vpop.f32.mrb[5].mxu0 }
 0x136   :  { %v374_v63 = vmax.f32 %v370_v58, 0.0  ;;  %v360_v0 = vmul.f32 %v692_v46, %v339_v59  ;;  %v736_v1 = vadd.f32 %v735_v62, %v734_v60 }
 0x138   :  { %v380_v2 = vrot.slane %v374_v63, 7  ;;  %v371_v3 = vadd.f32 %v693_v49, %v360_v0  ;;  %v344_v4 = vadd.f32 %v736_v1, %v343_v57  ;;  %v737_v5 = vpop.f32.mrb[6].mxu0  ;;  %538 = vmatprep.mubr.f32.mxu0 %v374_v63  ;;  %v389_v10 = vrot.slane %v374_v63, 1 }
 0x139   :  { %v738_v6 = vpop.f32.mrb[7].mxu0 }
 0x13a   :  { %385 = vst [vmem:[#allocation3] sm:$0xfe] %v380_v2  ;;  %v375_v7 = vmax.f32 %v371_v3, 0.0  ;;  %v361_v8 = vmul.f32 %v692_v46, %v344_v4  ;;  %v739_v9 = vadd.f32 %v738_v6, %v737_v5 }
 0x13c   :  { %v381_v11 = vrot.slane %v375_v7, 7  ;;  %v390_v12 = vrot.slane %v375_v7, 1  ;;  %v372_v13 = vadd.f32 %v693_v49, %v361_v8  ;;  %v349_v14 = vadd.f32 %v861_v51, %v739_v9 }
 0x13e   :  { %v382_v15 = vsel %vm86_vm1, %v380_v2, %v381_v11  ;;  %v391_v16 = vsel %vm96_vm0, %v389_v10, %v390_v12  ;;  %395 = vst [vmem:[#allocation3 + $0x28] sm:$0x7f] %v390_v12  ;;  %v376_v17 = vmax.f32 %v372_v13, 0.0  ;;  %v362_v18 = vmul.f32 %v692_v46, %v349_v14 }
 0x13f   :  { %894 = vmatprep.mubr.f32.mxu1 %v391_v16 }
 0x140   :  { %v398_v19 = vrot.slane %v376_v17, 7  ;;  %v373_v20 = vadd.f32 %v693_v49, %v362_v18  ;;  %v407_v23 = vrot.slane %v376_v17, 1 }
 0x141   :  { %v414_v21 = vld [vmem:[#allocation3] sm:$0xff] }
 0x142   :  { %403 = vst [vmem:[#allocation3 + $0x30] sm:$0xfe] %v398_v19  ;;  %v377_v22 = vmax.f32 %v373_v20, 0.0  ;;  %539 = vmatmul.mubr.f32.vlgmr.msra.gmra.mrb[8].mxu0 %v414_v21 }
 0x143   :  { %543 = vmatprep.mubr.f32.mxu0 %v375_v7 }
 0x144   :  { %v399_v24 = vrot.slane %v377_v22, 7  ;;  %v408_v25 = vrot.slane %v377_v22, 1 }
 0x145   :  { %v419_v26 = vld [vmem:[#allocation3 + $0x28] sm:$0xff] }
 0x146   :  { %v400_v27 = vsel %vm86_vm1, %v398_v19, %v399_v24  ;;  %v409_v28 = vsel %vm96_vm0, %v407_v23, %v408_v25  ;;  %413 = vst [vmem:[#allocation3 + $0x58] sm:$0x7f] %v408_v25  ;;  %544 = vmatmul.mubr.f32.gmra.mrb[10].mxu0 %v382_v15  ;;  %895 = vmatmul.mubr.f32.vlgmr.msra.gmra.mrb[4].mxu1 %v419_v26 }
 0x147   :  { %548 = vmatprep.mubr.f32.mxu0 %v376_v17  ;;  %897 = vmatprep.mubr.f32.mxu1 %v409_v28 }
 0x149   :  { %v420_v29 = vld [vmem:[#allocation3 + $0x30] sm:$0xff] }
 0x14a   :  { %549 = vmatmul.mubr.f32.gmra.mrb[12].mxu0 %v420_v29 }
 0x14b   :  { %553 = vmatprep.mubr.f32.mxu0 %v377_v22 }
 0x14d   :  { %v425_v30 = vld [vmem:[#allocation3 + $0x58] sm:$0xff] }
 0x14e   :  { %554 = vmatmul.mubr.f32.gmra.mrb[14].mxu0 %v400_v27  ;;  %898 = vmatmul.mubr.f32.gmra.mrb[6].mxu1 %v425_v30 }
 0x215   :  { %v792_v31 = vpop.f32.mrb[8].mxu0 }
 0x216   :  { %v793_v32 = vpop.f32.mrb[9].mxu0 }
 0x217   :  { %v794_v33 = vadd.f32 %v793_v32, %v792_v31 }
 0x219   :  { %v795_v34 = vpop.f32.mrb[10].mxu0  ;;  %v896_v35 = vpop.f32.mrb[4].mxu1 }
 0x21a   :  { %v796_v36 = vpop.f32.mrb[11].mxu0  ;;  %v625_v38 = vpop.f32.mrb[5].mxu1 }
 0x21b   :  { %v797_v39 = vadd.f32 %v796_v36, %v795_v34  ;;  %v626_v40 = vadd.f32 %v794_v33, %v625_v38 }
 0x21d   :  { %v631_v42 = vadd.f32 %v896_v35, %v797_v39  ;;  %v651_v43 = vmul.f32 %v694_v37, %v626_v40  ;;  %v798_v44 = vpop.f32.mrb[12].mxu0 }
 0x21e   :  { %v799_v45 = vpop.f32.mrb[13].mxu0 }
 0x21f   :  { %v652_v46 = vmul.f32 %v694_v37, %v631_v42  ;;  %v662_v47 = vadd.f32 %v695_v41, %v651_v43  ;;  %v800_v48 = vadd.f32 %v799_v45, %v798_v44 }
 0x221   :  { %v663_v49 = vadd.f32 %v695_v41, %v652_v46  ;;  %v666_v50 = vadd.f32 %v662_v47, %v1228_v53  ;;  %v801_v51 = vpop.f32.mrb[14].mxu0  ;;  %v899_v52 = vpop.f32.mrb[6].mxu1 }
 0x222   :  { %v802_v56 = vpop.f32.mrb[15].mxu0  ;;  %v635_v57 = vpop.f32.mrb[7].mxu1 }
 0x223   :  { %v667_v58 = vadd.f32 %v663_v49, %v1230_v54  ;;  %670 = vst [vmem:[#allocation10] sm:$0xff] %v666_v50  ;;  %v803_v59 = vadd.f32 %v802_v56, %v801_v51  ;;  %v636_v60 = vadd.f32 %v800_v48, %v635_v57 }
 0x225   :  { %671 = vst [vmem:[#allocation10 + $0x8] sm:$0xff] %v667_v58  ;;  %v641_v62 = vadd.f32 %v899_v52, %v803_v59  ;;  %v653_v63 = vmul.f32 %v694_v37, %v636_v60 }
 0x227   :  { %v654_v0 = vmul.f32 %v694_v37, %v641_v62  ;;  %v664_v1 = vadd.f32 %v695_v41, %v653_v63 }
 0x229   :  { %v665_v2 = vadd.f32 %v695_v41, %v654_v0  ;;  %v668_v3 = vadd.f32 %v664_v1, %v1232_v55 }
 0x22b   :  { %v669_v53 = vadd.f32 %v665_v2, %v1238_v61  ;;  %672 = vst [vmem:[#allocation10 + $0x10] sm:$0xff] %v668_v3 }
 0x22d   :  { %673 = vst [vmem:[#allocation10 + $0x18] sm:$0xff] %v669_v53 }
 0x22e   :  { %1112 = shalt.err (!%p1109_p0)
}
 0x22f   :  { %s1113_s24 = scalar_lea.hbm %s1300_s7, 512 }
 0x230   :  { %p1114_p1 = scmp.ne.s32.totalorder %s1300_s7, %s1113_s24  ;;  %p1117_p2 = scmp.lt.u32.totalorder %s1113_s24, %s1300_s7 }
 0x232   :  { %p1119_p3 = pnand %p1117_p2, %p1114_p1 }
 0x234   :  { %1122 = shalt.err (!%p1119_p3)
}
 0x235   :  { %685 = dma.vmem_to_hbm [thread:$0]  %s680_s6, 512, %s1300_s7, [#allocation6], %s1131_s13, %s1131_s13, %s1132_s14  }
 0x236   :  { %1127 = dma.done.wait [#allocation6], 512  }
 0x237   :  { %1128 = vsyncadd [#allocation6], 4294966784 }
 0x238   :  { %689 = vsyncpa [#allocation5], 1 }
 0x239   :  { %690 = vsyncpa [#allocation8], 1 }
 0x23a   :  { %691 = vsyncpa [#allocation6], 1 }

</bundles_post_ra>
